<compile_context>
chip_gen: v7x
topology: tpu7x:2x2x1
jax: 0.10.0
libtpu: 0.0.40
codegen_flags: <defaults>
</compile_context>

<pallas_src>
import jax
import jax.numpy as jnp
from jax import lax
from jax.experimental import pallas as pl
from jax.experimental.pallas import tpu as pltpu


def _backproject_kernel(invk_ref, depth_ref, out_ref):
    # invk_ref:  (B, 9)  f32 in SMEM          -- flattened inv_K[:, :3, :3]
    # depth_ref: (1, 1, TILE_H, W) in VMEM    -- depth tile, native dtype
    # out_ref:   (1, 4, TILE_H, W) in VMEM    -- camera-coordinate tile
    b = pl.program_id(0)
    t = pl.program_id(1)

    d = depth_ref[0, 0].astype(jnp.float32)            # (TILE_H, W), in-kernel cast
    th, w = d.shape

    # Pixel coordinates generated on-chip (no HBM coords input).
    x = lax.broadcasted_iota(jnp.int32, (th, w), 1).astype(jnp.float32)   # col idx
    y = lax.broadcasted_iota(jnp.int32, (th, w), 0).astype(jnp.float32)   # local row
    y = y + (t * th).astype(jnp.float32)                                  # global row

    # inv_K scalars from SMEM (row-major 3x3 of batch b).
    k00 = invk_ref[b, 0]; k01 = invk_ref[b, 1]; k02 = invk_ref[b, 2]
    k10 = invk_ref[b, 3]; k11 = invk_ref[b, 4]; k12 = invk_ref[b, 5]
    k20 = invk_ref[b, 6]; k21 = invk_ref[b, 7]; k22 = invk_ref[b, 8]

    # cam = (K @ [x; y; 1]) * depth, one sublane/lane-dense plane per channel.
    od = out_ref.dtype
    out_ref[0, 0] = ((k00 * x + k01 * y + k02) * d).astype(od)
    out_ref[0, 1] = ((k10 * x + k11 * y + k12) * d).astype(od)
    out_ref[0, 2] = ((k20 * x + k21 * y + k22) * d).astype(od)
    out_ref[0, 3] = jnp.ones((th, w), od)               # homogeneous coordinate


def _round_up(x, m):
    return ((x + m - 1) // m) * m


def _pick_tile_h(B, H, W, pair_budget_bytes, out_itemsize):
    """Largest row-tile (multiple of 8, <= H) within the (depth+out) block-pair
    VMEM budget, keeping enough grid steps for pipelining / v7x dual-TC balance."""
    if H <= 8:
        return H
    w_pad = _round_up(W, 128)                            # lane padding in VMEM
    bytes_per_row = w_pad * (4 * out_itemsize + 4)       # 4 out rows + 1 depth row
    budget_rows = max(8, (pair_budget_bytes // bytes_per_row) // 8 * 8)
    # Aim for >= ~8 total grid steps, but never shred tiles below 64 rows for it.
    tiles_wanted = max(1, pl.cdiv(8, B))
    rows_for_steps = max(8, _round_up(pl.cdiv(H, tiles_wanted), 8))
    step_rows = max(rows_for_steps, 64)
    h_floor8 = (H // 8) * 8                              # keep tile <= H, mult of 8
    tile = max(8, min(budget_rows, step_rows, h_floor8))
    # Rebalance so a ragged last tile isn't nearly empty.
    n = pl.cdiv(H, tile)
    tile = max(8, min(h_floor8, _round_up(pl.cdiv(H, n), 8)))
    return tile


def make_backproject_depth(batch_size, height, width, *, tile_h=None,
                           pair_budget_bytes=12 << 20, out_dtype=jnp.float32):
    """Returns forward(depth, inv_K) -> (B, 4, H, W), mirroring the nn.Module."""
    B, H, W = int(batch_size), int(height), int(width)
    out_dtype = jnp.dtype(out_dtype)

    if tile_h is None:
        TILE_H = _pick_tile_h(B, H, W, pair_budget_bytes, out_dtype.itemsize)
    else:
        TILE_H = int(tile_h)
        assert TILE_H == H or TILE_H % 8 == 0, "tile_h must be a multiple of 8 (or H)"
    n_tiles = pl.cdiv(H, TILE_H)                         # ragged last tile allowed

    # Explicit scoped-VMEM limit: double-buffered block pair + headroom.
    # Stays <= 48 MiB so it is safe on v7x (64 MiB physical) while lifting
    # v5e's 16 MiB default when larger tiles are used.
    w_pad = _round_up(W, 128)
    pair_bytes = TILE_H * w_pad * (4 * out_dtype.itemsize + 4)
    vmem_limit = int(max(16 << 20, min(48 << 20, 2 * pair_bytes + (8 << 20))))

    cost = pl.CostEstimate(
        flops=15 * B * H * W,                            # 9 mul + 6 add per pixel
        transcendentals=0,
        bytes_accessed=B * H * W * 4 + B * 4 * H * W * out_dtype.itemsize + B * 9 * 4,
    )

    kernel = pl.pallas_call(
        _backproject_kernel,
        out_shape=jax.ShapeDtypeStruct((B, 4, H, W), out_dtype),
        grid_spec=pltpu.PrefetchScalarGridSpec(
            num_scalar_prefetch=0,
            grid=(B, n_tiles),
            in_specs=[
                # Tiny per-batch 3x3 (flattened) -> resident in SMEM, scalar reads.
                pl.BlockSpec(memory_space=pltpu.MemorySpace.SMEM),
                # Depth: one (TILE_H, W) row-tile per grid step, native dtype.
                pl.BlockSpec((1, 1, TILE_H, W), lambda b, t: (b, 0, t, 0)),
            ],
            out_specs=pl.BlockSpec((1, 4, TILE_H, W), lambda b, t: (b, 0, t, 0)),
        ),
        compiler_params=pltpu.CompilerParams(
            # Both axes independent -> shardable across TensorCores (v7x megacore).
            dimension_semantics=("parallel", "parallel"),
            vmem_limit_bytes=vmem_limit,
        ),
        cost_estimate=cost,
    )

    def forward(depth, inv_K):
        # depth: (B, 1, H, W) or (B, H, W), any float dtype (cast happens in-kernel)
        # inv_K: (B, 4, 4)
        depth = depth.reshape(B, 1, H, W)
        invk_flat = inv_K[:, :3, :3].reshape(B, 9).astype(jnp.float32)
        return kernel(invk_flat, depth)                  # (B, 4, H, W)

    return forward


def _reference(depth, inv_K, B, H, W):
    xs = jnp.arange(W, dtype=jnp.float32)
    ys = jnp.arange(H, dtype=jnp.float32)
    gx, gy = jnp.meshgrid(xs, ys, indexing="xy")
    coords = jnp.concatenate(
        [jnp.stack([gx, gy], 0).reshape(2, H * W), jnp.ones((1, H * W), jnp.float32)], 0)
    cam = jnp.einsum("bij,jp->bip", inv_K[:, :3, :3].astype(jnp.float32), coords)
    cam = depth.astype(jnp.float32).reshape(B, 1, -1) * cam
    cam = jnp.concatenate([cam, jnp.ones((B, 1, H * W), jnp.float32)], 1)
    return cam.reshape(B, 4, H, W)


if __name__ == "__main__":
    key = jax.random.PRNGKey(0)
    k1, k2, k3 = jax.random.split(key, 3)

    # Case 1: divisible H, explicit row tiling -> grid (2, 2).
    B, H, W = 2, 16, 16
    depth = jax.random.uniform(k1, (B, 1, H, W), jnp.float32, 0.1, 10.0)
    inv_K = jnp.tile(jnp.eye(4, dtype=jnp.float32)[None], (B, 1, 1))
    inv_K = inv_K + 0.01 * jax.random.normal(k2, (B, 4, 4), jnp.float32)
    out = jax.block_until_ready(make_backproject_depth(B, H, W, tile_h=8)(depth, inv_K))
    ref = _reference(depth, inv_K, B, H, W)
    assert out.shape == (B, 4, H, W), out.shape
    assert jnp.allclose(out, ref, atol=1e-5, rtol=1e-5)

    # Case 2: H not a multiple of the tile (ragged last block) + auto tile pick.
    B2, H2, W2 = 2, 20, 16
    depth2 = jax.random.uniform(k3, (B2, 1, H2, W2), jnp.float32, 0.1, 10.0)
    out2 = jax.block_until_ready(make_backproject_depth(B2, H2, W2)(depth2, inv_K))
    ref2 = _reference(depth2, inv_K, B2, H2, W2)
    assert out2.shape == (B2, 4, H2, W2), out2.shape
    assert jnp.allclose(out2, ref2, atol=1e-5, rtol=1e-5)

    print("KERNEL_OK")
</pallas_src>

<mosaic_0001>
module attributes {stable_mosaic.version = 11 : i64} {
  func.func @_backproject_kernel(%arg0: i32, %arg1: i32, %arg2: memref<2x9xf32, #tpu.memory_space<smem>>, %arg3: memref<1x1x8x16xf32, #tpu.memory_space<vmem>>, %arg4: memref<1x4x8x16xf32, #tpu.memory_space<vmem>>) attributes {dimension_semantics = [#tpu.dimension_semantics<parallel>, #tpu.dimension_semantics<parallel>], iteration_bounds = array<i64: 2, 2>, scalar_prefetch = 0 : i64, scratch_operands = 0 : i64, tpu.core_type = #tpu.core_type<tc>, window_params = [{transform_indices = @transform_0, window_bounds = array<i64: 2, 9>}, {transform_indices = @transform_1, window_bounds = array<i64: 1, 1, 8, 16>}, {transform_indices = @transform_2, window_bounds = array<i64: 1, 4, 8, 16>}]} {
    %c0 = arith.constant 0 : index
    %c0_0 = arith.constant 0 : index
    %c0_1 = arith.constant 0 : index
    %c0_2 = arith.constant 0 : index
    %0 = vector.load %arg3[%c0, %c0_0, %c0_1, %c0_2] : memref<1x1x8x16xf32, #tpu.memory_space<vmem>>, vector<1x1x8x16xf32>
    %1 = vector.shape_cast %0 : vector<1x1x8x16xf32> to vector<8x16xf32>
    %2 = tpu.iota {dimensions = array<i32: 1>} : vector<8x16xi32>
    %3 = arith.sitofp %2 : vector<8x16xi32> to vector<8x16xf32>
    %4 = tpu.iota {dimensions = array<i32: 0>} : vector<8x16xi32>
    %5 = arith.sitofp %4 : vector<8x16xi32> to vector<8x16xf32>
    %c8_i32 = arith.constant 8 : i32
    %6 = arith.muli %arg1, %c8_i32 : i32
    %7 = arith.sitofp %6 : i32 to f32
    %8 = vector.broadcast %7 : f32 to vector<8x16xf32>
    %9 = arith.addf %5, %8 : vector<8x16xf32>
    %10 = arith.index_cast %arg0 : i32 to index
    %c0_3 = arith.constant 0 : index
    %11 = memref.load %arg2[%10, %c0_3] : memref<2x9xf32, #tpu.memory_space<smem>>
    %12 = arith.index_cast %arg0 : i32 to index
    %c1 = arith.constant 1 : index
    %13 = memref.load %arg2[%12, %c1] : memref<2x9xf32, #tpu.memory_space<smem>>
    %14 = arith.index_cast %arg0 : i32 to index
    %c2 = arith.constant 2 : index
    %15 = memref.load %arg2[%14, %c2] : memref<2x9xf32, #tpu.memory_space<smem>>
    %16 = arith.index_cast %arg0 : i32 to index
    %c3 = arith.constant 3 : index
    %17 = memref.load %arg2[%16, %c3] : memref<2x9xf32, #tpu.memory_space<smem>>
    %18 = arith.index_cast %arg0 : i32 to index
    %c4 = arith.constant 4 : index
    %19 = memref.load %arg2[%18, %c4] : memref<2x9xf32, #tpu.memory_space<smem>>
    %20 = arith.index_cast %arg0 : i32 to index
    %c5 = arith.constant 5 : index
    %21 = memref.load %arg2[%20, %c5] : memref<2x9xf32, #tpu.memory_space<smem>>
    %22 = arith.index_cast %arg0 : i32 to index
    %c6 = arith.constant 6 : index
    %23 = memref.load %arg2[%22, %c6] : memref<2x9xf32, #tpu.memory_space<smem>>
    %24 = arith.index_cast %arg0 : i32 to index
    %c7 = arith.constant 7 : index
    %25 = memref.load %arg2[%24, %c7] : memref<2x9xf32, #tpu.memory_space<smem>>
    %26 = arith.index_cast %arg0 : i32 to index
    %c8 = arith.constant 8 : index
    %27 = memref.load %arg2[%26, %c8] : memref<2x9xf32, #tpu.memory_space<smem>>
    %28 = vector.broadcast %11 : f32 to vector<8x16xf32>
    %29 = arith.mulf %28, %3 : vector<8x16xf32>
    %30 = vector.broadcast %13 : f32 to vector<8x16xf32>
    %31 = arith.mulf %30, %9 : vector<8x16xf32>
    %32 = arith.addf %29, %31 : vector<8x16xf32>
    %33 = vector.broadcast %15 : f32 to vector<8x16xf32>
    %34 = arith.addf %32, %33 : vector<8x16xf32>
    %35 = arith.mulf %34, %1 : vector<8x16xf32>
    %c0_4 = arith.constant 0 : index
    %c0_5 = arith.constant 0 : index
    %c0_6 = arith.constant 0 : index
    %c0_7 = arith.constant 0 : index
    %36 = vector.load %arg4[%c0_4, %c0_5, %c0_6, %c0_7] : memref<1x4x8x16xf32, #tpu.memory_space<vmem>>, vector<1x1x8x16xf32>
    %37 = vector.shape_cast %36 : vector<1x1x8x16xf32> to vector<8x16xf32>
    %38 = vector.shape_cast %35 : vector<8x16xf32> to vector<1x1x8x16xf32>
    tpu.vector_store %arg4[%c0_4, %c0_5, %c0_6, %c0_7], %38 {strides = array<i32>} : memref<1x4x8x16xf32, #tpu.memory_space<vmem>>, vector<1x1x8x16xf32>,
    %39 = vector.broadcast %17 : f32 to vector<8x16xf32>
    %40 = arith.mulf %39, %3 : vector<8x16xf32>
    %41 = vector.broadcast %19 : f32 to vector<8x16xf32>
    %42 = arith.mulf %41, %9 : vector<8x16xf32>
    %43 = arith.addf %40, %42 : vector<8x16xf32>
    %44 = vector.broadcast %21 : f32 to vector<8x16xf32>
    %45 = arith.addf %43, %44 : vector<8x16xf32>
    %46 = arith.mulf %45, %1 : vector<8x16xf32>
    %c0_8 = arith.constant 0 : index
    %c1_9 = arith.constant 1 : index
    %c0_10 = arith.constant 0 : index
    %c0_11 = arith.constant 0 : index
    %47 = vector.load %arg4[%c0_8, %c1_9, %c0_10, %c0_11] : memref<1x4x8x16xf32, #tpu.memory_space<vmem>>, vector<1x1x8x16xf32>
    %48 = vector.shape_cast %47 : vector<1x1x8x16xf32> to vector<8x16xf32>
    %49 = vector.shape_cast %46 : vector<8x16xf32> to vector<1x1x8x16xf32>
    tpu.vector_store %arg4[%c0_8, %c1_9, %c0_10, %c0_11], %49 {strides = array<i32>} : memref<1x4x8x16xf32, #tpu.memory_space<vmem>>, vector<1x1x8x16xf32>,
    %50 = vector.broadcast %23 : f32 to vector<8x16xf32>
    %51 = arith.mulf %50, %3 : vector<8x16xf32>
    %52 = vector.broadcast %25 : f32 to vector<8x16xf32>
    %53 = arith.mulf %52, %9 : vector<8x16xf32>
    %54 = arith.addf %51, %53 : vector<8x16xf32>
    %55 = vector.broadcast %27 : f32 to vector<8x16xf32>
    %56 = arith.addf %54, %55 : vector<8x16xf32>
    %57 = arith.mulf %56, %1 : vector<8x16xf32>
    %c0_12 = arith.constant 0 : index
    %c2_13 = arith.constant 2 : index
    %c0_14 = arith.constant 0 : index
    %c0_15 = arith.constant 0 : index
    %58 = vector.load %arg4[%c0_12, %c2_13, %c0_14, %c0_15] : memref<1x4x8x16xf32, #tpu.memory_space<vmem>>, vector<1x1x8x16xf32>
    %59 = vector.shape_cast %58 : vector<1x1x8x16xf32> to vector<8x16xf32>
    %60 = vector.shape_cast %57 : vector<8x16xf32> to vector<1x1x8x16xf32>
    tpu.vector_store %arg4[%c0_12, %c2_13, %c0_14, %c0_15], %60 {strides = array<i32>} : memref<1x4x8x16xf32, #tpu.memory_space<vmem>>, vector<1x1x8x16xf32>,
    %cst = arith.constant 1.000000e+00 : f32
    %61 = vector.broadcast %cst : f32 to vector<8x16xf32>
    %c0_16 = arith.constant 0 : index
    %c3_17 = arith.constant 3 : index
    %c0_18 = arith.constant 0 : index
    %c0_19 = arith.constant 0 : index
    %62 = vector.load %arg4[%c0_16, %c3_17, %c0_18, %c0_19] : memref<1x4x8x16xf32, #tpu.memory_space<vmem>>, vector<1x1x8x16xf32>
    %63 = vector.shape_cast %62 : vector<1x1x8x16xf32> to vector<8x16xf32>
    %64 = vector.shape_cast %61 : vector<8x16xf32> to vector<1x1x8x16xf32>
    tpu.vector_store %arg4[%c0_16, %c3_17, %c0_18, %c0_19], %64 {strides = array<i32>} : memref<1x4x8x16xf32, #tpu.memory_space<vmem>>, vector<1x1x8x16xf32>,
    return
  }
  func.func @transform_0(%arg0: i32, %arg1: i32) -> (i32, i32) {
    %c0_i32 = arith.constant 0 : i32
    %c0_i32_0 = arith.constant 0 : i32
    %c0_i32_1 = arith.constant 0 : i32
    return %c0_i32, %c0_i32_0 : i32, i32
  }
  func.func @transform_1(%arg0: i32, %arg1: i32) -> (i32, i32, i32, i32) {
    %c0_i32 = arith.constant 0 : i32
    %c0_i32_0 = arith.constant 0 : i32
    %c0_i32_1 = arith.constant 0 : i32
    return %arg0, %c0_i32, %arg1, %c0_i32_0 : i32, i32, i32, i32
  }
  func.func @transform_2(%arg0: i32, %arg1: i32) -> (i32, i32, i32, i32) {
    %c0_i32 = arith.constant 0 : i32
    %c0_i32_0 = arith.constant 0 : i32
    %c0_i32_1 = arith.constant 0 : i32
    return %arg0, %c0_i32, %arg1, %c0_i32_0 : i32, i32, i32, i32
  }
}

</mosaic_0001>

<bundles_post_ra>
// kernel: tpu_custom_call.1
= control target key start
LH: loop header
LB: loop body
LE: loop exit
PB: predicated region body
PF: predicated region fallthrough
CT: control target
= control target key end

     0   :  { %s898_s0 = inlined_call_operand.hbm [shape: f32[2,9], index: 0, kind: input, shape index: {}]   ;;  %s899_s1 = inlined_call_operand.hbm [shape: f32[2,1,16,16], index: 1, kind: input, shape index: {}]   ;;  %s900_s2 = inlined_call_operand.hbm [shape: f32[2,4,16,16], index: 2, kind: output, shape index: {}]  }
   0x1   :  { %907 = sst [smem:[#allocation13_spill]] %s898_s0 }
   0x2   :  { %908 = sst [smem:[#allocation14_spill]] %s899_s1 }
   0x3   :  { %7 = vsyncpa [#allocation5], 0 }
   0x4   :  { %8 = vsyncpa [#allocation3], 0 }
   0x5   :  { %10 = vsyncpa [#allocation3 + $0x1], 0 }
   0x6   :  { %11 = vsyncpa [#allocation4], 0 }
   0x7   :  { %13 = vsyncpa [#allocation4 + $0x1], 0  ;;  %s649_s9 = smov 0   ;;  %s651_s10 = smov 0  }
   0x8   :  { %s653_s11 = smov 0   ;;  %s655_s12 = smov 0  }
   0x9   :  { %s657_s13 = smov 0   ;;  %s659_s14 = smov 0  }
   0xa   :  { %s661_s15 = smov 0   ;;  %s663_s16 = smov 0  }
   0xb LB: > { %s365_s17 = sadd.s32 4294967295, %s625_s16   ;;  %s366_s18 = sadd.s32 4294967294, %s625_s16   ;;  %s625_s16 = sphi %s663_s16, %s19_s16   ;;  %s621_s15 = sphi %s661_s15, %s933_s15   ;;  %s617_s14 = sphi %s659_s14, %s932_s14   ;;  %s613_s13 = sphi %s657_s13, %s931_s13   ;;  %s609_s12 = sphi %s655_s12, %s930_s12   ;;  %s605_s11 = sphi %s653_s11, %s929_s11   ;;  %s601_s10 = sphi %s651_s10, %s928_s10   ;;  %s597_s9 = sphi %s649_s9, %s927_s9  }
   0xc   : > { %p74_p0 = scmp.ne.s32.totalorder %s601_s10, %s597_s9  ;;  %p693_p1 = scmp.eq.s32.totalorder %s365_s17, 0 }
   0xd   : > { %p697_p2 = scmp.eq.s32.totalorder %s365_s17, 3  ;;  %p106_p3 = scmp.eq.s32.totalorder %s366_s18, 3 }
   0xe   : > { %s909_s19 = scalar_select %p693_p1, 1, 0 }
   0xf   : > { %p703_p4 = por %p693_p1, %p74_p0  ;;  %p367_p5 = scmp.ge.s32.totalorder %s625_s16, 1 }
  0x10   : > { %p708_p6 = por %p106_p3, %p74_p0  ;;  %p113_p7 = scmp.lt.s32.totalorder %s625_s16, 5 }
  0x11   : > { %s911_s21 = scalar_select %p703_p4, 1, 0 }
  0x12   : > { %s912_s22 = scalar_select %p708_p6, 1, 0 }
  0x13   : > { %p713_p8 = pnand %p367_p5, %p113_p7  ;;  %s28_s24 = sadd.s32 1, %s617_s14 }
  0x14   : > { %913 = sst [smem:[#allocation11_spill]] %s912_s22  ;;  %s31_s25 = sadd.s32 1, %s621_s15 }
  0x15   : > { %p395_p9 = pneg %p713_p8  ;;  %p29_p11 = scmp.ge.s32.totalorder %s28_s24, 2 }
  0x16   : > { %s915_s0 = sld [smem:[#allocation13_spill]] }
  0x17   : > { %p396_p10 = pnand %p395_p9, %p693_p1 }
  0x19   : > { %p482_p13 = pneg %p396_p10 }
  0x1c   : > { %s480_s28 = scalar_lea.hbm %s915_s0, 32 }
  0x1d   : > { %p481_p12 = scmp.ne.s32.totalorder %s915_s0, %s480_s28  ;;  %p487_p5 = scmp.lt.u32.totalorder %s480_s28, %s915_s0 }
  0x1f   : > { %p483_p0 = pnand %p482_p13, %p481_p12 }
  0x21   : > { %p484_p3 = pneg %p483_p0 }
  0x23   : > { %p489_p7 = pnand %p487_p5, %p484_p3 }
  0x25   : > { %492 = shalt.err (!%p489_p7)
}
  0x26   : > { %s627_s5 = smov [#allocation2]   ;;  %s935_s24 = smov (%p29_p11, %s28_s24), 0 }
  0x27   : > { %398 = dma.hbm_to_smem (!%p396_p10), %s915_s0, 32, %s627_s5, [#allocation5]  }
  0x28   : > { %916 = sst [smem:[#allocation12_spill]] %s935_s24  ;;  %s937_s25 = smov (!%p29_p11, %s31_s25), %s621_s15 }
  0x29   : > { %s57_s8 = ssub.s32 %s617_s14, %s935_s24  ;;  %s61_s17 = sadd.s32 1, %s605_s11 }
  0x2a   : > { %p33_p9 = scmp.ge.s32.totalorder %s937_s25, 2  ;;  %p68_p12 = scmp.ne.s32.totalorder %s605_s11, %s601_s10 }
  0x2b   : > { %p69_p13 = scmp.eq.s32.totalorder %s625_s16, 0  ;;  %p408_p0 = scmp.lt.s32.totalorder %s625_s16, 4 }
  0x2c   : > { %s939_s25 = smov (%p33_p9, %s937_s25), 0  ;;  %p753_p10 = por %p697_p2, %p68_p12 }
  0x2d   : > { %p747_p3 = por %p69_p13, %p68_p12  ;;  %s56_s27 = ssub.s32 %s621_s15, %s939_s25 }
  0x2e   : > { %s918_s26 = scalar_select %p753_p10, 1, 0 }
  0x2f   : > { %s135_s28 = sand.u32 1, %s605_s11   ;;  %s58_s29 = sor.u32 %s57_s8, %s56_s27 }
  0x30   : > { %p59_p11 = scmp.eq.s32.totalorder %s58_s29, 0  ;;  %s370_s30 = sshll.u32 %s135_s28, 3 }
  0x31   : > { %s371_s3 = sshll.u32 %s621_s15, 1  ;;  %s139_s6 = scalar_lea.vmem [#allocation6], %s370_s30 }
  0x32   : > { %s762_s4 = scalar_select %p59_p11, %s605_s11, %s61_s17  }
  0x33   : > { %s144_s5 = sadd.s32 %s617_s14, %s371_s3  ;;  %s148_s7 = sshll.u32 %s139_s6, 4  ;;  %s765_s7 = int_to_ptr.vmem [resolvable:$true] %s148_s7 }
  0x34   : > { %s372_s0 = sshll.u32 %s144_s5, 7  ;;  %s919_s1 = sld [smem:[#allocation14_spill]] }
  0x35   : > { %p776_p2 = pnand %p408_p0, %p747_p3  ;;  %s136_s17 = scalar_lea.sflag [#allocation3], %s135_s28 }
  0x37   : > { %p495_p7 = pneg %p776_p2 }
  0x3a   : > { %s770_s22 = scalar_lea.hbm %s919_s1, %s372_s0  ;;  %s498_s18 = scalar_lea.hbm %s919_s1, 512 }
  0x3b   : > { %s493_s27 = scalar_lea.hbm %s770_s22, 128  ;;  %p499_p13 = scmp.lt.u32.totalorder %s770_s22, %s919_s1 }
  0x3c   : > { %p494_p5 = scmp.ne.s32.totalorder %s770_s22, %s493_s27  ;;  %p500_p0 = scmp.lt.u32.totalorder %s498_s18, %s493_s27 }
  0x3d   : > { %p502_p11 = scmp.lt.u32.totalorder %s493_s27, %s770_s22 }
  0x3e   : > { %p496_p9 = pnand %p495_p7, %p494_p5  ;;  %p501_p3 = por %p500_p0, %p499_p13 }
  0x40   : > { %p497_p12 = pneg %p496_p9  ;;  %p503_p6 = por %p502_p11, %p501_p3 }
  0x42   : > { %p504_p10 = pnand %p503_p6, %p497_p12 }
  0x44   : > { %507 = shalt.err (!%p504_p10)
}
  0x45   : > { %s508_s28 = scalar_lea.vmem %s765_s7, 128  ;;  %s628_s3 = smov [#allocation6]  }
  0x46   : > { %p509_p5 = scmp.ne.s32.totalorder %s765_s7, %s508_s28  ;;  %s513_s5 = sshll.u32 %s628_s3, 4  ;;  %s514_s5 = int_to_ptr.vmem [resolvable:$false] %s513_s5 }
  0x47   : > { %s515_s6 = scalar_lea.vmem %s514_s5, 256  ;;  %p516_p1 = scmp.lt.s32.totalorder %s765_s7, %s514_s5 }
  0x48   : > { %p511_p9 = pnand %p509_p5, %p495_p7  ;;  %p517_p13 = scmp.lt.s32.totalorder %s515_s6, %s508_s28 }
  0x4a   : > { %p512_p4 = pneg %p511_p9  ;;  %p518_p0 = por %p517_p13, %p516_p1 }
  0x4c   : > { %p519_p3 = pnand %p518_p0, %p512_p4 }
  0x4e   : > { %522 = shalt.err (!%p519_p3)
}
  0x4f   : > { %402 = dma.hbm_to_vmem [thread:$0]  (!%p776_p2), %s770_s22, 128, %s765_s7, %s136_s17  }
  0x50   : > { %157 = sbr.rel (%p713_p8) target bundleno = 135 (0x87), region = 28  ;;  %p921_p6 = scmp.ne.s32.totalorder (!%p713_p8), %s909_s19, 0 }
  0x57   : > { %584 = dma.done.wait (%p921_p6), [#allocation5], 32  }
  0x58   : > { %586 = vsyncadd (%p921_p6), [#allocation5], 4294967264  ;;  %s812_s20 = sand.u32 1, %s601_s10   ;;  %p922_p1 = scmp.ne.s32.totalorder %s911_s21, 0 }
  0x59   : > { %s375_s27 = sshll.u32 %s812_s20, 3  ;;  %s164_s8 = scalar_lea.sflag [#allocation3], %s812_s20 }
  0x5a   : > { %s816_s0 = scalar_lea.vmem [#allocation6], %s375_s27 }
  0x5b   : > { %588 = dma.done.wait (%p922_p1), %s164_s8, 128  }
  0x5c   : > { %590 = vsyncadd (%p922_p1), %s164_s8, 4294967168 }
  0x5d   : > { %172 = sfence }
  0x5e   : > { %s376_s19 = sshll.u32 %s812_s20, 5  ;;  %v190_v0 = vlaneseq  ;;  %s377_s22 = sshll.u32 %s609_s12, 3  ;;  %vm226_vm0 = vcmask 130048   ;;  %v629_v3 = vmov 1.0   ;;  %v189_v16 = vld [vmem:[%s816_s0] sm:$0xff] }
  0x5f   : > { %s197_s23 = scvt.s32.f32 %s377_s22  ;;  %s378_s7 = sshll.u32 %s613_s13, 7 }
  0x60   : > { %v191_v1 = vand.u32 127, %v190_v0  ;;  %v194_v2 = vshrl.u32 %v190_v0, 7  ;;  %s825_s17 = scalar_lea.vmem [#allocation7], %s376_s19  ;;  %s201_s21 = sld [smem:[#allocation2 + %s378_s7]] }
  0x61   : > { %381 = vst.msk [vmem:[%s825_s17 + $0x18] sm:$0xff] %vm226_vm0, %v629_v3  ;;  %s202_s24 = sadd.s32 1, %s378_s7  ;;  %v198_v5 = vstv %s197_s23  ;;  %s204_s29 = sadd.s32 2, %s378_s7 }
  0x62   : > { %v195_v4 = vcvt.s32.f32 %v194_v2  ;;  %s203_s18 = sld [smem:[#allocation2 + %s202_s24]]  ;;  %v192_v6 = vcvt.s32.f32 %v191_v1  ;;  %s206_s28 = sadd.s32 3, %s378_s7 }
  0x63   : > { %s205_s30 = sld [smem:[#allocation2 + %s204_s29]]  ;;  %s208_s3 = sadd.s32 4, %s378_s7 }
  0x64   : > { %v199_v7 = vadd.f32 %v198_v5, %v195_v4  ;;  %s207_s5 = sld [smem:[#allocation2 + %s206_s28]]  ;;  %s210_s27 = sadd.s32 5, %s378_s7 }
  0x65   : > { %s209_s6 = sld [smem:[#allocation2 + %s208_s3]]  ;;  %s212_s8 = sadd.s32 6, %s378_s7 }
  0x66   : > { %v218_v8 = vstv %s201_s21  ;;  %s211_s19 = sld [smem:[#allocation2 + %s210_s27]]  ;;  %s214_s1 = sadd.s32 7, %s378_s7 }
  0x67   : > { %s213_s22 = sld [smem:[#allocation2 + %s212_s8]]  ;;  %v219_v9 = vmul.f32 %v218_v8, %v192_v6  ;;  %s216_s23 = sadd.s32 8, %s378_s7 }
  0x68   : > { %v220_v10 = vstv %s203_s18  ;;  %s215_s24 = sld [smem:[#allocation2 + %s214_s1]]  ;;  %s383_s21 = sshll.u32 %s613_s13, 3 }
  0x69   : > { %v221_v11 = vmul.f32 %v220_v10, %v199_v7  ;;  %s217_s29 = sld [smem:[#allocation2 + %s216_s23]]  ;;  %v223_v12 = vstv %s205_s30  ;;  %s262_s1 = sadd.s32 %s609_s12, %s383_s21 }
  0x6a   : > { %v228_v14 = vstv %s207_s5  ;;  %s265_s0 = sshll.u32 %s825_s17, 4  ;;  %s384_s7 = sshll.u32 %s262_s1, 7  ;;  %s835_s0 = int_to_ptr.vmem [resolvable:$true] %s265_s0 }
  0x6b   : > { %v222_v13 = vadd.f32 %v221_v11, %v219_v9  ;;  %v230_v15 = vstv %s209_s6  ;;  %v229_v17 = vmul.f32 %v228_v14, %v192_v6  ;;  %s842_s12 = scalar_lea.hbm %s900_s2, %s384_s7  ;;  %s251_s30 = scalar_lea.sflag [#allocation4], %s812_s20 }
  0x6c   : > { %v231_v18 = vmul.f32 %v230_v15, %v199_v7  ;;  %v233_v20 = vstv %s211_s19  ;;  %s523_s28 = scalar_lea.vmem %s835_s0, 512  ;;  %p923_p8 = scmp.ne.s32.totalorder %s918_s26, 0 }
  0x6d   : > { %v224_v19 = vadd.f32 %v223_v12, %v222_v13  ;;  %v238_v21 = vstv %s213_s22  ;;  %p524_p4 = scmp.ne.s32.totalorder %s835_s0, %s523_s28  ;;  %s630_s3 = smov [#allocation7]  }
  0x6e   : > { %v232_v22 = vadd.f32 %v231_v18, %v229_v17  ;;  %v239_v23 = vmul.f32 %v238_v21, %v192_v6  ;;  %v240_v25 = vstv %s215_s24  ;;  %s527_s5 = sshll.u32 %s630_s3, 4  ;;  %s528_s5 = int_to_ptr.vmem [resolvable:$false] %s527_s5 }
  0x6f   : > { %v225_v24 = vmul.f32 %v224_v19, %v189_v16  ;;  %v241_v27 = vmul.f32 %v240_v25, %v199_v7  ;;  %v243_v28 = vstv %s217_s29  ;;  %p525_p10 = pnand %p524_p4, %p923_p8  ;;  %s529_s6 = scalar_lea.vmem %s528_s5, 1024 }
  0x70   : > { %v234_v26 = vadd.f32 %v233_v20, %v232_v22  ;;  %p530_p7 = scmp.lt.s32.totalorder %s835_s0, %s528_s5  ;;  %p531_p12 = scmp.lt.s32.totalorder %s529_s6, %s523_s28 }
  0x71   : > { %227 = vst.msk [vmem:[%s825_s17] sm:$0xff] %vm226_vm0, %v225_v24  ;;  %v242_v30 = vadd.f32 %v241_v27, %v239_v23  ;;  %p526_p2 = pneg %p525_p10 }
  0x72   : > { %v235_v29 = vmul.f32 %v234_v26, %v189_v16  ;;  %p532_p11 = por %p531_p12, %p530_p7 }
  0x73   : > { %v244_v31 = vadd.f32 %v243_v28, %v242_v30 }
  0x74   : > { %379 = vst.msk [vmem:[%s825_s17 + $0x8] sm:$0xff] %vm226_vm0, %v235_v29  ;;  %p533_p5 = pnand %p532_p11, %p526_p2 }
  0x75   : > { %v245_v32 = vmul.f32 %v244_v31, %v189_v16 }
  0x77   : > { %380 = vst.msk [vmem:[%s825_s17 + $0x10] sm:$0xff] %vm226_vm0, %v245_v32 }
  0x78   : > { %536 = shalt.err (!%p533_p5)
}
  0x79   : > { %s537_s17 = scalar_lea.hbm %s842_s12, 512  ;;  %s541_s19 = scalar_lea.hbm %s900_s2, 2048 }
  0x7a   : > { %p538_p9 = scmp.ne.s32.totalorder %s842_s12, %s537_s17  ;;  %p542_p3 = scmp.lt.u32.totalorder %s842_s12, %s900_s2 }
  0x7b   : > { %p543_p6 = scmp.lt.u32.totalorder %s541_s19, %s537_s17  ;;  %p545_p4 = scmp.lt.u32.totalorder %s537_s17, %s842_s12 }
  0x7c   : > { %p539_p13 = pnand %p538_p9, %p923_p8 }
  0x7d   : > { %p544_p1 = por %p543_p6, %p542_p3 }
  0x7e   : > { %p540_p0 = pneg %p539_p13 }
  0x7f   : > { %p546_p10 = por %p545_p4, %p544_p1 }
  0x81   : > { %p547_p2 = pnand %p546_p10, %p540_p0 }
  0x83   : > { %550 = shalt.err (!%p547_p2)
}
  0x84   : > { %s631_s24 = smov 128   ;;  %s632_s29 = smov 256  }
  0x85   : > { %s633_s21 = smov 8  }
  0x86   : > { %393 = dma.vmem_to_hbm [thread:$0]  (%p923_p8), %s835_s0, 512, %s842_s12, %s251_s30, %s631_s24, %s632_s29, %s633_s21  }
  0x87 PF: > { %s924_s1 = sld [smem:[#allocation11_spill]]  ;;  %p410_p7 = scmp.ge.s32.totalorder %s625_s16, 2 }
  0x88   : > { %s280_s7 = sand.u32 1, %s597_s9  }
  0x89   : > { %s281_s13 = scalar_lea.sflag [#allocation4], %s280_s7 }
  0x8d   : > { %p925_p12 = scmp.ne.s32.totalorder %s924_s1, 0 }
  0x8f   : > { %p404_p11 = pnand %p410_p7, %p925_p12 }
  0x91   : > { %592 = dma.done.wait (!%p404_p11), %s281_s13, 512  }
  0x92   : > { %594 = vsyncadd (!%p404_p11), %s281_s13, 4294966784  ;;  %s19_s16 = sadd.s32 1, %s625_s16   ;;  %s926_s26 = sld [smem:[#allocation12_spill]] }
  0x93   : > { %p16_p5 = scmp.ge.s32.totalorder %s19_s16, 6   ;;  %s927_s9 = smov %s601_s10 }
  0x94   : > { %s928_s10 = smov %s605_s11  ;;  %s929_s11 = smov %s762_s4 }
  0x95   : > { %s930_s12 = smov %s617_s14  ;;  %s931_s13 = smov %s621_s15 }
  0x96   : > { %s933_s15 = smov %s939_s25  ;;  %18 = sbr.rel (!%p16_p5) target bundleno = 11 (0xb), region = 81 }
  0x98   : > { %s932_s14 = smov %s926_s26 }
  0x9d   :  { %286 = vsyncpa [#allocation3], 1 }
  0x9e   :  { %288 = vsyncpa [#allocation3 + $0x1], 1 }
  0x9f   :  { %289 = vsyncpa [#allocation4], 1 }
  0xa0   :  { %291 = vsyncpa [#allocation4 + $0x1], 1 }
  0xa1   :  { %292 = vsyncpa [#allocation5], 1 }
  0xa2   :  { %294 = vsyncpa [#allocation5 + $0x1], 1 }

</bundles_post_ra>
